<compile_context>
chip_gen: v7x
topology: tpu7x:2x2x1
jax: 0.10.0
libtpu: 0.0.40
codegen_flags: <defaults>
</compile_context>

<pallas_src>
import functools

import numpy as np

import jax
import jax.numpy as jnp
from jax.experimental import pallas as pl
from jax.experimental.pallas import tpu as pltpu

_OUT_LANES = 128  # lane-dense output slab width


def _cdiv(a, b):
    return -(-a // b)


def _round_up(a, b):
    return _cdiv(a, b) * b


def _actor_critic_kernel(x_ref, w1_ref, b1_ref, w2_ref, b2_ref, w3_ref, b3_ref,
                         epi_ref, out_ref):
    # ----- fused layer 1: (TB, D) @ (D, 2*H1)  [critic || actor] -----
    # x arrives pre-cast to the matmul operand dtype; accumulate in f32.
    h1 = jnp.dot(x_ref[...], w1_ref[...], preferred_element_type=jnp.float32)
    h1 = jnp.maximum(h1 + b1_ref[...], 0.0)

    # ----- fused layer 2 (block-diagonal): (TB, 2*H1) @ (2*H1, 2*H2) -----
    h2 = jnp.dot(h1.astype(w2_ref.dtype), w2_ref[...],
                 preferred_element_type=jnp.float32)
    h2 = jnp.maximum(h2 + b2_ref[...], 0.0)

    # ----- fused heads: (TB, 2*H2) @ (2*H2, 128)  [value | mu | sigma | pad] -----
    pre = jnp.dot(h2.astype(w3_ref.dtype), w3_ref[...],
                  preferred_element_type=jnp.float32) + b3_ref[...]

    # Column-wise epilogue via precomputed lane masks (no iota / int compares):
    #   epi[0] = 1 on the value lane          -> identity
    #   epi[1] = 2 on the mu lanes            -> 2 * tanh
    #   epi[2] = 1 on the sigma lanes         -> softplus
    #   epi[3] = 0.001 on the sigma lanes     -> + 0.001
    # Padded lanes get 0 and are sliced away in the wrapper.
    epi = epi_ref[...]
    m_val = epi[0:1, :]
    m_mu2 = epi[1:2, :]
    m_sig = epi[2:3, :]
    c_sig = epi[3:4, :]

    # Branch-free, overflow-safe softplus: max(x, 0) + log1p(exp(-|x|))
    sp = jnp.maximum(pre, 0.0) + jnp.log1p(jnp.exp(-jnp.abs(pre)))
    out = m_val * pre + m_mu2 * jnp.tanh(pre) + (m_sig * sp + c_sig)
    out_ref[...] = out.astype(out_ref.dtype)


def fuse_params(params, compute_dtype=jnp.bfloat16):
    """Fuse actor/critic weights into lane-dense matrices (done once).

    compute_dtype is the MXU operand dtype (default bf16 -> ~3x MXU rate on
    v5e, halves weight/activation VMEM).  Accumulation and nonlinearities stay
    f32, so value/mu/sigma carry ~1e-2-level error on the bf16 path.
    """
    H1 = params["c1_w"].shape[1]
    H2 = params["c2_w"].shape[1]
    A = params["mu_w"].shape[1]
    assert 1 + 2 * A <= _OUT_LANES, "fused head width must fit in one lane tile"

    # Layer 1: concat along N -> (D, 2*H1)
    w1 = jnp.concatenate([params["c1_w"], params["a1_w"]], axis=1)
    b1 = jnp.concatenate([params["c1_b"], params["a1_b"]], axis=1)

    # Layer 2: block-diagonal -> (2*H1, 2*H2); zero blocks keep branches separate.
    w2 = jnp.zeros((2 * H1, 2 * H2), jnp.float32)
    w2 = w2.at[:H1, :H2].set(params["c2_w"])
    w2 = w2.at[H1:, H2:].set(params["a2_w"])
    b2 = jnp.concatenate([params["c2_b"], params["a2_b"]], axis=1)

    # Heads: (2*H2, 128) zero-padded; col 0 = value, 1:1+A = mu, 1+A:1+2A = sigma.
    w3 = jnp.zeros((2 * H2, _OUT_LANES), jnp.float32)
    w3 = w3.at[:H2, 0:1].set(params["c3_w"])
    w3 = w3.at[H2:, 1:1 + A].set(params["mu_w"])
    w3 = w3.at[H2:, 1 + A:1 + 2 * A].set(params["sig_w"])
    b3 = jnp.zeros((1, _OUT_LANES), jnp.float32)
    b3 = b3.at[:, 0:1].set(params["c3_b"])
    b3 = b3.at[:, 1:1 + A].set(params["mu_b"])
    b3 = b3.at[:, 1 + A:1 + 2 * A].set(params["sig_b"])

    # Precomputed epilogue lane masks (constants folded in).
    col = np.arange(_OUT_LANES)
    m_val = (col == 0).astype(np.float32)
    m_mu = ((col >= 1) & (col < 1 + A)).astype(np.float32)
    m_sig = ((col >= 1 + A) & (col < 1 + 2 * A)).astype(np.float32)
    epi = np.stack([m_val, 2.0 * m_mu, m_sig, 0.001 * m_sig]).astype(np.float32)

    return {
        # Only matmul operands are cast (f32 accumulate + f32 nonlinearities stay).
        "w1": w1.astype(compute_dtype), "b1": b1,
        "w2": w2.astype(compute_dtype), "b2": b2,
        "w3": w3.astype(compute_dtype), "b3": b3,
        "epi": jnp.asarray(epi),
        "num_actions": A,
    }


def actor_critic_forward(x, fused, *, batch_tile=2048):
    """x: (B, num_inputs) f32. fused: output of fuse_params. Returns (value, mu, sigma)."""
    num_actions = fused["num_actions"]
    w1, b1 = fused["w1"], fused["b1"]
    w2, b2 = fused["w2"], fused["b2"]
    w3, b3 = fused["w3"], fused["b3"]
    epi = fused["epi"]

    B, D = x.shape
    assert w1.shape[0] == D

    # Cast x once in the wrapper to the MXU operand dtype (halves x HBM/VMEM
    # traffic on the bf16 path; no in-kernel cast needed).
    x = x.astype(w1.dtype)

    # Batch tile: multiple of 8, capped at batch_tile, and chosen so the grid
    # has >= 2 steps whenever B > 8 (so "parallel" semantics shards the batch
    # across both TensorCores on v7x; 1 TC on v5e/v6e -> negligible cost).
    n_steps = max(2, _cdiv(B, batch_tile))
    tb = min(batch_tile, max(8, _round_up(_cdiv(B, n_steps), 8)))
    padded_B = _round_up(B, tb)
    if padded_B != B:
        x = jnp.pad(x, ((0, padded_B - B), (0, 0)))
    grid = (padded_B // tb,)

    out_dtype = jnp.float32 if w1.dtype == jnp.float32 else jnp.bfloat16

    def full_spec(arr):
        return pl.BlockSpec(arr.shape, lambda i: (0,) * arr.ndim)

    # Explicit VMEM budget sized to the working set (v5e scoped default is only
    # 16 MiB; v7x physical is only 64 MiB).  2x headroom, clamped.
    x_row = 128 * x.dtype.itemsize                      # lane-padded x block row
    out_row = _OUT_LANES * jnp.dtype(out_dtype).itemsize
    h_row = (w1.shape[1] + w2.shape[1] + 3 * _OUT_LANES) * 4   # f32 intermediates
    const_bytes = 2 * sum(a.size * a.dtype.itemsize
                          for a in (w1, b1, w2, b2, w3, b3, epi)) + (1 << 20)
    est = tb * (2 * x_row + 2 * out_row + h_row) + const_bytes
    vmem_limit = int(min(max(2 * est, 16 << 20), 48 << 20))

    flops = 2 * padded_B * (D * w1.shape[1]
                            + w2.shape[0] * w2.shape[1]
                            + w3.shape[0] * w3.shape[1])
    transcendentals = 3 * padded_B * _OUT_LANES  # tanh + exp + log1p over the slab
    bytes_accessed = (x.size * x.dtype.itemsize
                      + sum(a.size * a.dtype.itemsize
                            for a in (w1, b1, w2, b2, w3, b3, epi))
                      + padded_B * _OUT_LANES * jnp.dtype(out_dtype).itemsize)

    out = pl.pallas_call(
        _actor_critic_kernel,
        out_shape=jax.ShapeDtypeStruct((padded_B, _OUT_LANES), out_dtype),
        grid=grid,
        in_specs=[
            pl.BlockSpec((tb, D), lambda i: (i, 0)),   # x: tiled over batch
            full_spec(w1), full_spec(b1),
            full_spec(w2), full_spec(b2),
            full_spec(w3), full_spec(b3),
            full_spec(epi),
        ],
        out_specs=pl.BlockSpec((tb, _OUT_LANES), lambda i: (i, 0)),
        compiler_params=pltpu.CompilerParams(
            dimension_semantics=("parallel",),   # shards batch across TCs on v7x
            vmem_limit_bytes=vmem_limit),
        cost_estimate=pl.CostEstimate(
            flops=flops, transcendentals=transcendentals,
            bytes_accessed=bytes_accessed),
    )(x, w1, b1, w2, b2, w3, b3, epi)

    value = out[:B, 0:1].astype(jnp.float32)
    mu = out[:B, 1:1 + num_actions].astype(jnp.float32)
    sigma = out[:B, 1 + num_actions:1 + 2 * num_actions].astype(jnp.float32)
    return value, mu, sigma


def _init_linear(key, fan_in, fan_out):
    # Mimic PyTorch nn.Linear default init: U(-1/sqrt(fan_in), 1/sqrt(fan_in)).
    # Weight stored pre-transposed as (fan_in, fan_out); bias as (1, fan_out).
    kw, kb = jax.random.split(key)
    bound = 1.0 / (fan_in ** 0.5)
    w = jax.random.uniform(kw, (fan_in, fan_out), jnp.float32, -bound, bound)
    b = jax.random.uniform(kb, (1, fan_out), jnp.float32, -bound, bound)
    return w, b


def init_params(key, num_inputs, num_actions, hidden_size1=64, hidden_size2=256):
    keys = jax.random.split(key, 7)
    p = {}
    p["c1_w"], p["c1_b"] = _init_linear(keys[0], num_inputs, hidden_size1)
    p["c2_w"], p["c2_b"] = _init_linear(keys[1], hidden_size1, hidden_size2)
    p["c3_w"], p["c3_b"] = _init_linear(keys[2], hidden_size2, 1)
    p["a1_w"], p["a1_b"] = _init_linear(keys[3], num_inputs, hidden_size1)
    p["a2_w"], p["a2_b"] = _init_linear(keys[4], hidden_size1, hidden_size2)
    p["mu_w"], p["mu_b"] = _init_linear(keys[5], hidden_size2, num_actions)
    p["sig_w"], p["sig_b"] = _init_linear(keys[6], hidden_size2, num_actions)
    return p


def _reference_forward(x, p):
    # Pure-JAX reference (matches the PyTorch module).
    v = jax.nn.relu(x @ p["c1_w"] + p["c1_b"])
    v = jax.nn.relu(v @ p["c2_w"] + p["c2_b"])
    value = v @ p["c3_w"] + p["c3_b"]
    a = jax.nn.relu(x @ p["a1_w"] + p["a1_b"])
    a = jax.nn.relu(a @ p["a2_w"] + p["a2_b"])
    mu = 2.0 * jnp.tanh(a @ p["mu_w"] + p["mu_b"])
    sigma = jax.nn.softplus(a @ p["sig_w"] + p["sig_b"]) + 0.001
    return value, mu, sigma


if __name__ == "__main__":
    key = jax.random.PRNGKey(0)
    k_param, k_x = jax.random.split(key)

    batch = 8
    num_inputs = 8      # small continuous-control state dimension
    num_actions = 4

    params = init_params(k_param, num_inputs, num_actions)
    x = jax.random.normal(k_x, (batch, num_inputs), jnp.float32)
    v_ref, mu_ref, sig_ref = _reference_forward(x, params)

    # --- f32 operand path (exact module semantics) ---
    fused_f32 = fuse_params(params, jnp.float32)
    value, mu, sigma = actor_critic_forward(x, fused_f32)
    jax.block_until_ready((value, mu, sigma))

    assert value.shape == (batch, 1)
    assert mu.shape == (batch, num_actions)
    assert sigma.shape == (batch, num_actions)
    assert jnp.allclose(value, v_ref, atol=1e-5, rtol=1e-5)
    assert jnp.allclose(mu, mu_ref, atol=1e-5, rtol=1e-5)
    assert jnp.allclose(sigma, sig_ref, atol=1e-5, rtol=1e-5)

    # --- bf16 MXU-operand default fast path (f32 accumulate + f32 nonlinearities) ---
    fused_bf16 = fuse_params(params)   # bf16 is now the default
    v16, mu16, sig16 = actor_critic_forward(x, fused_bf16)
    jax.block_until_ready((v16, mu16, sig16))
    assert jnp.allclose(v16, v_ref, atol=5e-2, rtol=5e-2)
    assert jnp.allclose(mu16, mu_ref, atol=5e-2, rtol=5e-2)
    assert jnp.allclose(sig16, sig_ref, atol=5e-2, rtol=5e-2)

    # --- multi-step grid + batch padding (exercises >=2 parallel grid steps) ---
    x2 = jax.random.normal(jax.random.PRNGKey(1), (200, num_inputs), jnp.float32)
    v2_ref, mu2_ref, sig2_ref = _reference_forward(x2, params)
    v2, mu2, sig2 = actor_critic_forward(x2, fused_f32)
    jax.block_until_ready((v2, mu2, sig2))
    assert v2.shape == (200, 1) and mu2.shape == (200, num_actions)
    assert jnp.allclose(v2, v2_ref, atol=1e-5, rtol=1e-5)
    assert jnp.allclose(mu2, mu2_ref, atol=1e-5, rtol=1e-5)
    assert jnp.allclose(sig2, sig2_ref, atol=1e-5, rtol=1e-5)

    print("KERNEL_OK")
</pallas_src>

<mosaic_0001>
module attributes {stable_mosaic.version = 11 : i64} {
  func.func @_actor_critic_kernel(%arg0: i32, %arg1: memref<8x8xf32, #tpu.memory_space<vmem>>, %arg2: memref<8x128xf32, #tpu.memory_space<vmem>>, %arg3: memref<1x128xf32, #tpu.memory_space<vmem>>, %arg4: memref<128x512xf32, #tpu.memory_space<vmem>>, %arg5: memref<1x512xf32, #tpu.memory_space<vmem>>, %arg6: memref<512x128xf32, #tpu.memory_space<vmem>>, %arg7: memref<1x128xf32, #tpu.memory_space<vmem>>, %arg8: memref<4x128xf32, #tpu.memory_space<vmem>>, %arg9: memref<8x128xf32, #tpu.memory_space<vmem>>) attributes {dimension_semantics = [#tpu.dimension_semantics<parallel>], iteration_bounds = array<i64: 1>, scalar_prefetch = 0 : i64, scratch_operands = 0 : i64, tpu.core_type = #tpu.core_type<tc>, window_params = [{transform_indices = @transform_0, window_bounds = array<i64: 8, 8>}, {pipeline_mode = #tpu.pipeline_mode<synchronous>, transform_indices = @transform_1, window_bounds = array<i64: 8, 128>}, {pipeline_mode = #tpu.pipeline_mode<synchronous>, transform_indices = @transform_2, window_bounds = array<i64: 1, 128>}, {pipeline_mode = #tpu.pipeline_mode<synchronous>, transform_indices = @transform_3, window_bounds = array<i64: 128, 512>}, {pipeline_mode = #tpu.pipeline_mode<synchronous>, transform_indices = @transform_4, window_bounds = array<i64: 1, 512>}, {pipeline_mode = #tpu.pipeline_mode<synchronous>, transform_indices = @transform_5, window_bounds = array<i64: 512, 128>}, {pipeline_mode = #tpu.pipeline_mode<synchronous>, transform_indices = @transform_6, window_bounds = array<i64: 1, 128>}, {pipeline_mode = #tpu.pipeline_mode<synchronous>, transform_indices = @transform_7, window_bounds = array<i64: 4, 128>}, {transform_indices = @transform_8, window_bounds = array<i64: 8, 128>}]} {
    %c0 = arith.constant 0 : index
    %c0_0 = arith.constant 0 : index
    %0 = vector.load %arg1[%c0, %c0_0] : memref<8x8xf32, #tpu.memory_space<vmem>>, vector<8x8xf32>
    %c0_1 = arith.constant 0 : index
    %c0_2 = arith.constant 0 : index
    %1 = vector.load %arg2[%c0_1, %c0_2] : memref<8x128xf32, #tpu.memory_space<vmem>>, vector<8x128xf32>
    %cst = arith.constant dense<0.000000e+00> : vector<8x128xf32>
    %2 = tpu.matmul %0, %1, %cst {dimension_numbers = #tpu.dot_dimension_numbers<[1], [0], [0], [1], [0, 0, 1, 1], [], []>} : vector<8x8xf32>, vector<8x128xf32>, vector<8x128xf32> -> vector<8x128xf32>
    %c0_3 = arith.constant 0 : index
    %c0_4 = arith.constant 0 : index
    %3 = vector.load %arg3[%c0_3, %c0_4] : memref<1x128xf32, #tpu.memory_space<vmem>>, vector<1x128xf32>
    %4 = vector.broadcast %3 : vector<1x128xf32> to vector<8x128xf32>
    %5 = arith.addf %2, %4 : vector<8x128xf32>
    %cst_5 = arith.constant 0.000000e+00 : f32
    %6 = vector.broadcast %cst_5 : f32 to vector<8x128xf32>
    %7 = arith.maximumf %5, %6 : vector<8x128xf32>
    %c0_6 = arith.constant 0 : index
    %c0_7 = arith.constant 0 : index
    %8 = vector.load %arg4[%c0_6, %c0_7] : memref<128x512xf32, #tpu.memory_space<vmem>>, vector<128x512xf32>
    %cst_8 = arith.constant dense<0.000000e+00> : vector<8x512xf32>
    %9 = tpu.matmul %7, %8, %cst_8 {dimension_numbers = #tpu.dot_dimension_numbers<[1], [0], [0], [1], [0, 0, 1, 1], [], []>} : vector<8x128xf32>, vector<128x512xf32>, vector<8x512xf32> -> vector<8x512xf32>
    %c0_9 = arith.constant 0 : index
    %c0_10 = arith.constant 0 : index
    %10 = vector.load %arg5[%c0_9, %c0_10] : memref<1x512xf32, #tpu.memory_space<vmem>>, vector<1x512xf32>
    %11 = vector.broadcast %10 : vector<1x512xf32> to vector<8x512xf32>
    %12 = arith.addf %9, %11 : vector<8x512xf32>
    %cst_11 = arith.constant 0.000000e+00 : f32
    %13 = vector.broadcast %cst_11 : f32 to vector<8x512xf32>
    %14 = arith.maximumf %12, %13 : vector<8x512xf32>
    %c0_12 = arith.constant 0 : index
    %c0_13 = arith.constant 0 : index
    %15 = vector.load %arg6[%c0_12, %c0_13] : memref<512x128xf32, #tpu.memory_space<vmem>>, vector<512x128xf32>
    %cst_14 = arith.constant dense<0.000000e+00> : vector<8x128xf32>
    %16 = tpu.matmul %14, %15, %cst_14 {dimension_numbers = #tpu.dot_dimension_numbers<[1], [0], [0], [1], [0, 0, 1, 1], [], []>} : vector<8x512xf32>, vector<512x128xf32>, vector<8x128xf32> -> vector<8x128xf32>
    %c0_15 = arith.constant 0 : index
    %c0_16 = arith.constant 0 : index
    %17 = vector.load %arg7[%c0_15, %c0_16] : memref<1x128xf32, #tpu.memory_space<vmem>>, vector<1x128xf32>
    %18 = vector.broadcast %17 : vector<1x128xf32> to vector<8x128xf32>
    %19 = arith.addf %16, %18 : vector<8x128xf32>
    %c0_17 = arith.constant 0 : index
    %c0_18 = arith.constant 0 : index
    %20 = vector.load %arg8[%c0_17, %c0_18] : memref<4x128xf32, #tpu.memory_space<vmem>>, vector<4x128xf32>
    %21 = vector.extract_strided_slice %20 {offsets = [0, 0], sizes = [1, 128], strides = [1, 1]} : vector<4x128xf32> to vector<1x128xf32>
    %22 = vector.extract_strided_slice %20 {offsets = [1, 0], sizes = [1, 128], strides = [1, 1]} : vector<4x128xf32> to vector<1x128xf32>
    %23 = vector.extract_strided_slice %20 {offsets = [2, 0], sizes = [1, 128], strides = [1, 1]} : vector<4x128xf32> to vector<1x128xf32>
    %24 = vector.extract_strided_slice %20 {offsets = [3, 0], sizes = [1, 128], strides = [1, 1]} : vector<4x128xf32> to vector<1x128xf32>
    %cst_19 = arith.constant 0.000000e+00 : f32
    %25 = vector.broadcast %cst_19 : f32 to vector<8x128xf32>
    %26 = arith.maximumf %19, %25 : vector<8x128xf32>
    %27 = math.absf %19 : vector<8x128xf32>
    %cst_20 = arith.constant 0.000000e+00 : f32
    %28 = vector.broadcast %cst_20 : f32 to vector<8x128xf32>
    %29 = arith.subf %28, %27 : vector<8x128xf32>
    %30 = math.exp %29 : vector<8x128xf32>
    %31 = math.log1p %30 : vector<8x128xf32>
    %32 = arith.addf %26, %31 : vector<8x128xf32>
    %33 = vector.broadcast %21 : vector<1x128xf32> to vector<8x128xf32>
    %34 = arith.mulf %33, %19 : vector<8x128xf32>
    %35 = math.tanh %19 : vector<8x128xf32>
    %36 = vector.broadcast %22 : vector<1x128xf32> to vector<8x128xf32>
    %37 = arith.mulf %36, %35 : vector<8x128xf32>
    %38 = arith.addf %34, %37 : vector<8x128xf32>
    %39 = vector.broadcast %23 : vector<1x128xf32> to vector<8x128xf32>
    %40 = arith.mulf %39, %32 : vector<8x128xf32>
    %41 = vector.broadcast %24 : vector<1x128xf32> to vector<8x128xf32>
    %42 = arith.addf %40, %41 : vector<8x128xf32>
    %43 = arith.addf %38, %42 : vector<8x128xf32>
    %c0_21 = arith.constant 0 : index
    %c0_22 = arith.constant 0 : index
    %44 = vector.load %arg9[%c0_21, %c0_22] : memref<8x128xf32, #tpu.memory_space<vmem>>, vector<8x128xf32>
    tpu.vector_store %arg9[%c0_21, %c0_22], %43 {strides = array<i32>} : memref<8x128xf32, #tpu.memory_space<vmem>>, vector<8x128xf32>,
    return
  }
  func.func @transform_0(%arg0: i32) -> (i32, i32) {
    %c0_i32 = arith.constant 0 : i32
    %c0_i32_0 = arith.constant 0 : i32
    return %arg0, %c0_i32 : i32, i32
  }
  func.func @transform_1(%arg0: i32) -> (i32, i32) {
    %c0_i32 = arith.constant 0 : i32
    %c0_i32_0 = arith.constant 0 : i32
    %c0_i32_1 = arith.constant 0 : i32
    return %c0_i32, %c0_i32_0 : i32, i32
  }
  func.func @transform_2(%arg0: i32) -> (i32, i32) {
    %c0_i32 = arith.constant 0 : i32
    %c0_i32_0 = arith.constant 0 : i32
    %c0_i32_1 = arith.constant 0 : i32
    return %c0_i32, %c0_i32_0 : i32, i32
  }
  func.func @transform_3(%arg0: i32) -> (i32, i32) {
    %c0_i32 = arith.constant 0 : i32
    %c0_i32_0 = arith.constant 0 : i32
    %c0_i32_1 = arith.constant 0 : i32
    return %c0_i32, %c0_i32_0 : i32, i32
  }
  func.func @transform_4(%arg0: i32) -> (i32, i32) {
    %c0_i32 = arith.constant 0 : i32
    %c0_i32_0 = arith.constant 0 : i32
    %c0_i32_1 = arith.constant 0 : i32
    return %c0_i32, %c0_i32_0 : i32, i32
  }
  func.func @transform_5(%arg0: i32) -> (i32, i32) {
    %c0_i32 = arith.constant 0 : i32
    %c0_i32_0 = arith.constant 0 : i32
    %c0_i32_1 = arith.constant 0 : i32
    return %c0_i32, %c0_i32_0 : i32, i32
  }
  func.func @transform_6(%arg0: i32) -> (i32, i32) {
    %c0_i32 = arith.constant 0 : i32
    %c0_i32_0 = arith.constant 0 : i32
    %c0_i32_1 = arith.constant 0 : i32
    return %c0_i32, %c0_i32_0 : i32, i32
  }
  func.func @transform_7(%arg0: i32) -> (i32, i32) {
    %c0_i32 = arith.constant 0 : i32
    %c0_i32_0 = arith.constant 0 : i32
    %c0_i32_1 = arith.constant 0 : i32
    return %c0_i32, %c0_i32_0 : i32, i32
  }
  func.func @transform_8(%arg0: i32) -> (i32, i32) {
    %c0_i32 = arith.constant 0 : i32
    %c0_i32_0 = arith.constant 0 : i32
    return %arg0, %c0_i32 : i32, i32
  }
}

</mosaic_0001>

<bundles_post_ra>
// kernel: tpu_custom_call.1
= control target key start
LH: loop header
LB: loop body
LE: loop exit
PB: predicated region body
PF: predicated region fallthrough
CT: control target
= control target key end

     0   :  { %13 = vsyncpa [#allocation3], 0  ;;  %s1136_s0 = inlined_call_operand.hbm [shape: f32[8,8], index: 0, kind: input, shape index: {}]   ;;  %s1137_s1 = inlined_call_operand.hbm [shape: f32[8,128], index: 1, kind: input, shape index: {}]   ;;  %s1138_s2 = inlined_call_operand.vmem [shape: f32[1,128], index: 2, kind: input, shape index: {}]   ;;  %s1139_s3 = inlined_call_operand.hbm [shape: f32[128,512], index: 3, kind: input, shape index: {}]   ;;  %s1140_s4 = inlined_call_operand.vmem [shape: f32[1,512], index: 4, kind: input, shape index: {}]   ;;  %s1141_s5 = inlined_call_operand.hbm [shape: f32[512,128], index: 5, kind: input, shape index: {}]   ;;  %s1142_s6 = inlined_call_operand.vmem [shape: f32[1,128], index: 6, kind: input, shape index: {}]   ;;  %s1143_s7 = inlined_call_operand.vmem [shape: f32[4,128], index: 7, kind: input, shape index: {}]   ;;  %s1144_s8 = inlined_call_operand.hbm [shape: f32[8,128], index: 8, kind: output, shape index: {}]  }
   0x1   :  { %14 = vsyncpa [#allocation6], 0 }
   0x2   :  { %15 = vsyncpa [#allocation9], 0 }
   0x3   :  { %16 = vsyncpa [#allocation4], 0  ;;  %s1008_s27 = smov [#allocation5]   ;;  %s1009_s29 = smov [#allocation2]  }
   0x4   :  { %s33_s28 = sshll.u32 %s1008_s27, 4  ;;  %s23_s30 = sshll.u32 %s1009_s29, 4  ;;  %s34_s28 = int_to_ptr.vmem [resolvable:$true] %s33_s28  ;;  %s24_s30 = int_to_ptr.vmem [resolvable:$true] %s23_s30 }
   0x5   :  { %s890_s11 = scalar_lea.hbm %s1137_s1, 128 }
   0x6   :  { %p891_p0 = scmp.ne.s32.totalorder %s1137_s1, %s890_s11  ;;  %p894_p1 = scmp.lt.u32.totalorder %s890_s11, %s1137_s1 }
   0x8   :  { %p896_p2 = pnand %p894_p1, %p891_p0 }
   0xa   :  { %899 = shalt.err (!%p896_p2)
}
   0xb   :  { %s900_s16 = scalar_lea.vmem %s34_s28, 128  ;;  %p905_p4 = scmp.lt.s32.totalorder %s34_s28, %s34_s28 }
   0xc   :  { %p901_p3 = scmp.ne.s32.totalorder %s34_s28, %s900_s16  ;;  %p906_p5 = scmp.lt.s32.totalorder %s900_s16, %s900_s16 }
   0xe   :  { %p907_p6 = por %p906_p5, %p905_p4 }
  0x10   :  { %p908_p7 = pnand %p907_p6, %p901_p3 }
  0x12   :  { %911 = shalt.err (!%p908_p7)
}
  0x13   :  { %36 = dma.hbm_to_vmem [thread:$0]  %s1137_s1, 128, %s34_s28, [#allocation6]  }
  0x14   :  { %s912_s21 = scalar_lea.hbm %s1136_s0, 128 }
  0x15   :  { %p913_p8 = scmp.ne.s32.totalorder %s1136_s0, %s912_s21  ;;  %p916_p9 = scmp.lt.u32.totalorder %s912_s21, %s1136_s0 }
  0x17   :  { %p918_p10 = pnand %p916_p9, %p913_p8 }
  0x19   :  { %921 = shalt.err (!%p918_p10)
}
  0x1a   :  { %s922_s26 = scalar_lea.vmem %s24_s30, 128  ;;  %p927_p12 = scmp.lt.s32.totalorder %s24_s30, %s24_s30 }
  0x1b   :  { %p923_p11 = scmp.ne.s32.totalorder %s24_s30, %s922_s26  ;;  %p928_p13 = scmp.lt.s32.totalorder %s922_s26, %s922_s26 }
  0x1d   :  { %p929_p0 = por %p928_p13, %p927_p12 }
  0x1f   :  { %p930_p1 = pnand %p929_p0, %p923_p11 }
  0x21   :  { %933 = shalt.err (!%p930_p1)
}
  0x22   :  { %26 = dma.hbm_to_vmem [thread:$0]  %s1136_s0, 128, %s24_s30, [#allocation3]  }
  0x23   :  { %s1010_s28 = smov [#allocation7]   ;;  %s934_s11 = scalar_lea.hbm %s1139_s3, 8192 }
  0x24   :  { %s44_s29 = sshll.u32 %s1010_s28, 4  ;;  %p935_p2 = scmp.ne.s32.totalorder %s1139_s3, %s934_s11  ;;  %s45_s29 = int_to_ptr.vmem [resolvable:$true] %s44_s29 }
  0x25   :  { %p938_p3 = scmp.lt.u32.totalorder %s934_s11, %s1139_s3 }
  0x27   :  { %p940_p4 = pnand %p938_p3, %p935_p2 }
  0x29   :  { %943 = shalt.err (!%p940_p4)
}
  0x2a   :  { %s944_s16 = scalar_lea.vmem %s45_s29, 8192  ;;  %p949_p6 = scmp.lt.s32.totalorder %s45_s29, %s45_s29 }
  0x2b   :  { %p945_p5 = scmp.ne.s32.totalorder %s45_s29, %s944_s16  ;;  %p950_p7 = scmp.lt.s32.totalorder %s944_s16, %s944_s16 }
  0x2d   :  { %p951_p8 = por %p950_p7, %p949_p6 }
  0x2f   :  { %p952_p9 = pnand %p951_p8, %p945_p5 }
  0x31   :  { %955 = shalt.err (!%p952_p9)
}
  0x32   :  { %s1011_s0 = smov 512   ;;  %s1012_s30 = smov 32  }
  0x33   :  { %50 = dma.hbm_to_vmem [thread:$0]  %s1139_s3, 8192, %s45_s29, [#allocation6], %s1011_s0, %s1011_s0, %s1012_s30  }
  0x34   :  { %s1013_s19 = smov [#allocation8]   ;;  %s956_s23 = scalar_lea.hbm %s1141_s5, 8192 }
  0x35   :  { %s58_s20 = sshll.u32 %s1013_s19, 4  ;;  %p957_p10 = scmp.ne.s32.totalorder %s1141_s5, %s956_s23  ;;  %s59_s20 = int_to_ptr.vmem [resolvable:$true] %s58_s20 }
  0x36   :  { %p960_p11 = scmp.lt.u32.totalorder %s956_s23, %s1141_s5 }
  0x38   :  { %p962_p12 = pnand %p960_p11, %p957_p10 }
  0x3a   :  { %965 = shalt.err (!%p962_p12)
}
  0x3b   :  { %s966_s27 = scalar_lea.vmem %s59_s20, 8192  ;;  %p971_p0 = scmp.lt.s32.totalorder %s59_s20, %s59_s20 }
  0x3c   :  { %p967_p13 = scmp.ne.s32.totalorder %s59_s20, %s966_s27  ;;  %p972_p1 = scmp.lt.s32.totalorder %s966_s27, %s966_s27 }
  0x3e   :  { %p973_p2 = por %p972_p1, %p971_p0 }
  0x40   :  { %p974_p3 = pnand %p973_p2, %p967_p13 }
  0x42   :  { %977 = shalt.err (!%p974_p3)
}
  0x43   :  { %s1014_s3 = smov 128   ;;  %s1015_s28 = smov 8  }
  0x44   :  { %64 = dma.hbm_to_vmem [thread:$0]  %s1141_s5, 8192, %s59_s20, [#allocation9], %s1014_s3, %s1014_s3, %s1015_s28  }
  0x45   :  { %1000 = dma.done.wait [#allocation3], 128  }
  0x46   :  { %1001 = vsyncadd [#allocation3], 4294967168 }
  0x47   :  { %1002 = dma.done.wait [#allocation6], 8320  }
  0x48   :  { %1003 = vsyncadd [#allocation6], 4294958976 }
  0x49   :  { %1004 = dma.done.wait [#allocation9], 8192  }
  0x4a   :  { %1005 = vsyncadd [#allocation9], 4294959104  ;;  %v1016_v0 = vmov 0.0   ;;  %vm1017_vm0 = vmmov 0   ;;  %vm90_vm1 = vcmask 64512   ;;  %v82_v1 = vld [vmem:[#allocation5] sm:$0xff] }
  0x4b   :  { %740 = vmatprep.subr.mxu0 %v1016_v0  ;;  %742 = vmatprep.mubr.msk.f32.mxu0 %vm1017_vm0, %v1016_v0  ;;  %v81_v2 = vld [vmem:[#allocation2] sm:$0xff]  ;;  %v166_v3 = vld [vmem:[#allocation7 + $0x8] sm:$0xff]  ;;  %v168_v5 = vld [vmem:[#allocation7 + $0x18] sm:$0xff] }
  0x4c   :  { %315 = vmatprep.mubr.f32.mxu1 %v1016_v0  ;;  %741 = vmatpush3.msra.mxu0 %v82_v1  ;;  %v170_v4 = vld [vmem:[#allocation7 + $0x28] sm:$0xff]  ;;  %v172_v6 = vld [vmem:[#allocation7 + $0x38] sm:$0xff]  ;;  %v165_v9 = vld [vmem:[#allocation7] sm:$0xff] }
  0x4d   :  { %743 = vmatmul.mubr.msk.f32.vlgmr.msra.gmra.mrb[0].mxu0 %vm90_vm1, %v81_v2  ;;  %v745_v7 = vpack.c.bf16 %v170_v4, %v166_v3  ;;  %v777_v8 = vpack.c.bf16 %v172_v6, %v168_v5  ;;  %v169_v10 = vld [vmem:[#allocation7 + $0x20] sm:$0xff]  ;;  %v167_v11 = vld [vmem:[#allocation7 + $0x10] sm:$0xff]  ;;  %v174_v14 = vld [vmem:[#allocation7 + $0x48] sm:$0xff] }
  0x4e   :  { %v747_v12 = vpack.c.bf16 %v169_v10, %v165_v9  ;;  %v171_v13 = vld [vmem:[#allocation7 + $0x30] sm:$0xff]  ;;  %v178_v15 = vld [vmem:[#allocation7 + $0x68] sm:$0xff]  ;;  %386 = vmatprep.mubr.f32.mxu0 %v1016_v0  ;;  %v176_v18 = vld [vmem:[#allocation7 + $0x58] sm:$0xff] }
  0x4f   :  { %746 = vmatprep.subr.bf16.mxu1 %v745_v7  ;;  %778 = vmatprep.subr.bf16.mxu0 %v777_v8  ;;  %v779_v16 = vpack.c.bf16 %v171_v13, %v167_v11  ;;  %v749_v17 = vpack.c.bf16 %v178_v15, %v174_v14  ;;  %v180_v19 = vld [vmem:[#allocation7 + $0x78] sm:$0xff]  ;;  %v173_v20 = vld [vmem:[#allocation7 + $0x40] sm:$0xff]  ;;  %v175_v23 = vld [vmem:[#allocation7 + $0x50] sm:$0xff] }
  0x50   :  { %748 = vmatpush1.bf16.msra.mxu1 %v747_v12  ;;  %v781_v21 = vpack.c.bf16 %v180_v19, %v176_v18  ;;  %v177_v22 = vld [vmem:[#allocation7 + $0x60] sm:$0xff]  ;;  %v179_v24 = vld [vmem:[#allocation7 + $0x70] sm:$0xff]  ;;  %v182_v27 = vld [vmem:[#allocation7 + $0x88] sm:$0xff] }
  0x51   :  { %780 = vmatpush1.bf16.msra.mxu0 %v779_v16  ;;  %750 = vmatprep.subr.bf16.mxu1 %v749_v17  ;;  %v751_v25 = vpack.c.bf16 %v177_v22, %v173_v20  ;;  %v783_v26 = vpack.c.bf16 %v179_v24, %v175_v23  ;;  %v186_v28 = vld [vmem:[#allocation7 + $0xa8] sm:$0xff]  ;;  %v184_v29 = vld [vmem:[#allocation7 + $0x98] sm:$0xff]  ;;  %v181_v32 = vld [vmem:[#allocation7 + $0x80] sm:$0xff] }
  0x52   :  { %782 = vmatprep.subr.bf16.mxu0 %v781_v21  ;;  %v753_v30 = vpack.c.bf16 %v186_v28, %v182_v27  ;;  %v188_v31 = vld [vmem:[#allocation7 + $0xb8] sm:$0xff]  ;;  %v185_v33 = vld [vmem:[#allocation7 + $0xa0] sm:$0xff]  ;;  %v183_v35 = vld [vmem:[#allocation7 + $0x90] sm:$0xff] }
  0x53   :  { %v785_v34 = vpack.c.bf16 %v188_v31, %v184_v29  ;;  %v187_v36 = vld [vmem:[#allocation7 + $0xb0] sm:$0xff]  ;;  %v190_v37 = vld [vmem:[#allocation7 + $0xc8] sm:$0xff]  ;;  %v755_v38 = vpack.c.bf16 %v185_v33, %v181_v32  ;;  %v192_v40 = vld [vmem:[#allocation7 + $0xd8] sm:$0xff] }
  0x54   :  { %752 = vmatpush1.bf16.msra.mxu1 %v751_v25  ;;  %v194_v39 = vld [vmem:[#allocation7 + $0xe8] sm:$0xff]  ;;  %v196_v41 = vld [vmem:[#allocation7 + $0xf8] sm:$0xff]  ;;  %v787_v42 = vpack.c.bf16 %v187_v36, %v183_v35  ;;  %v189_v44 = vld [vmem:[#allocation7 + $0xc0] sm:$0xff] }
  0x55   :  { %784 = vmatpush1.bf16.msra.mxu0 %v783_v26  ;;  %754 = vmatprep.subr.bf16.mxu1 %v753_v30  ;;  %v757_v43 = vpack.c.bf16 %v194_v39, %v190_v37  ;;  %v193_v45 = vld [vmem:[#allocation7 + $0xe0] sm:$0xff]  ;;  %v191_v46 = vld [vmem:[#allocation7 + $0xd0] sm:$0xff]  ;;  %v789_v47 = vpack.c.bf16 %v196_v41, %v192_v40  ;;  %v198_v49 = vld [vmem:[#allocation7 + $0x108] sm:$0xff] }
  0x56   :  { %786 = vmatprep.subr.bf16.mxu0 %v785_v34  ;;  %v195_v48 = vld [vmem:[#allocation7 + $0xf0] sm:$0xff]  ;;  %v202_v50 = vld [vmem:[#allocation7 + $0x128] sm:$0xff]  ;;  %v200_v51 = vld [vmem:[#allocation7 + $0x118] sm:$0xff]  ;;  %v759_v53 = vpack.c.bf16 %v193_v45, %v189_v44 }
  0x57   :  { %v204_v52 = vld [vmem:[#allocation7 + $0x138] sm:$0xff]  ;;  %v791_v54 = vpack.c.bf16 %v195_v48, %v191_v46  ;;  %v761_v55 = vpack.c.bf16 %v202_v50, %v198_v49  ;;  %v197_v56 = vld [vmem:[#allocation7 + $0x100] sm:$0xff]  ;;  %v199_v58 = vld [vmem:[#allocation7 + $0x110] sm:$0xff] }
  0x58   :  { %756 = vmatpush1.bf16.msra.mxu1 %v755_v38  ;;  %v201_v57 = vld [vmem:[#allocation7 + $0x120] sm:$0xff]  ;;  %v793_v59 = vpack.c.bf16 %v204_v52, %v200_v51  ;;  %v203_v60 = vld [vmem:[#allocation7 + $0x130] sm:$0xff]  ;;  %v206_v61 = vld [vmem:[#allocation7 + $0x148] sm:$0xff] }
  0x59   :  { %788 = vmatpush1.bf16.msra.mxu0 %v787_v42  ;;  %758 = vmatprep.subr.bf16.mxu1 %v757_v43  ;;  %v210_v62 = vld [vmem:[#allocation7 + $0x168] sm:$0xff]  ;;  %v208_v63 = vld [vmem:[#allocation7 + $0x158] sm:$0xff]  ;;  %v763_v1 = vpack.c.bf16 %v201_v57, %v197_v56  ;;  %v795_v2 = vpack.c.bf16 %v203_v60, %v199_v58  ;;  %v205_v4 = vld [vmem:[#allocation7 + $0x140] sm:$0xff] }
  0x5a   :  { %790 = vmatprep.subr.bf16.mxu0 %v789_v47  ;;  %v212_v0 = vld [vmem:[#allocation7 + $0x178] sm:$0xff]  ;;  %v765_v3 = vpack.c.bf16 %v210_v62, %v206_v61  ;;  %v209_v5 = vld [vmem:[#allocation7 + $0x160] sm:$0xff]  ;;  %v207_v6 = vld [vmem:[#allocation7 + $0x150] sm:$0xff] }
  0x5b   :  { %v797_v7 = vpack.c.bf16 %v212_v0, %v208_v63  ;;  %v211_v8 = vld [vmem:[#allocation7 + $0x170] sm:$0xff]  ;;  %v214_v9 = vld [vmem:[#allocation7 + $0x188] sm:$0xff]  ;;  %v216_v11 = vld [vmem:[#allocation7 + $0x198] sm:$0xff]  ;;  %v767_v13 = vpack.c.bf16 %v209_v5, %v205_v4 }
  0x5c   :  { %760 = vmatpush1.bf16.msra.mxu1 %v759_v53  ;;  %v218_v10 = vld [vmem:[#allocation7 + $0x1a8] sm:$0xff]  ;;  %v220_v12 = vld [vmem:[#allocation7 + $0x1b8] sm:$0xff]  ;;  %v799_v14 = vpack.c.bf16 %v211_v8, %v207_v6  ;;  %v213_v16 = vld [vmem:[#allocation7 + $0x180] sm:$0xff] }
  0x5d   :  { %792 = vmatpush1.bf16.msra.mxu0 %v791_v54  ;;  %762 = vmatprep.subr.bf16.mxu1 %v761_v55  ;;  %v769_v15 = vpack.c.bf16 %v218_v10, %v214_v9  ;;  %v217_v17 = vld [vmem:[#allocation7 + $0x1a0] sm:$0xff]  ;;  %v801_v18 = vpack.c.bf16 %v220_v12, %v216_v11  ;;  %v215_v19 = vld [vmem:[#allocation7 + $0x190] sm:$0xff]  ;;  %v222_v23 = vld [vmem:[#allocation7 + $0x1c8] sm:$0xff] }
  0x5e   :  { %794 = vmatprep.subr.bf16.mxu0 %v793_v59  ;;  %v219_v20 = vld [vmem:[#allocation7 + $0x1b0] sm:$0xff]  ;;  %v771_v21 = vpack.c.bf16 %v217_v17, %v213_v16  ;;  %v226_v24 = vld [vmem:[#allocation7 + $0x1e8] sm:$0xff]  ;;  %v224_v25 = vld [vmem:[#allocation7 + $0x1d8] sm:$0xff] }
  0x5f   :  { %v803_v22 = vpack.c.bf16 %v219_v20, %v215_v19  ;;  %v773_v26 = vpack.c.bf16 %v226_v24, %v222_v23  ;;  %v228_v27 = vld [vmem:[#allocation7 + $0x1f8] sm:$0xff]  ;;  %v221_v28 = vld [vmem:[#allocation7 + $0x1c0] sm:$0xff]  ;;  %v223_v32 = vld [vmem:[#allocation7 + $0x1d0] sm:$0xff] }
  0x60   :  { %764 = vmatpush1.bf16.msra.mxu1 %v763_v1  ;;  %v225_v29 = vld [vmem:[#allocation7 + $0x1e0] sm:$0xff]  ;;  %v805_v30 = vpack.c.bf16 %v228_v27, %v224_v25  ;;  %v227_v33 = vld [vmem:[#allocation7 + $0x1f0] sm:$0xff]  ;;  %v414_v36 = vld [vmem:[#allocation8 + $0x88] sm:$0xff] }
  0x61   :  { %796 = vmatpush1.bf16.msra.mxu0 %v795_v2  ;;  %766 = vmatprep.subr.bf16.mxu1 %v765_v3  ;;  %v775_v31 = vpack.c.bf16 %v225_v29, %v221_v28  ;;  %v807_v34 = vpack.c.bf16 %v227_v33, %v223_v32  ;;  %v413_v35 = vld [vmem:[#allocation8 + $0x80] sm:$0xff]  ;;  %v446_v39 = vld [vmem:[#allocation8 + $0x188] sm:$0xff]  ;;  %v665_v41 = vld [vmem:[%s1138_s2] ss:$0 sm:$0xff] }
  0x62   :  { %798 = vmatprep.subr.bf16.mxu0 %v797_v7  ;;  %v445_v37 = vld [vmem:[#allocation8 + $0x180] sm:$0xff]  ;;  %v809_v38 = vpack.c.bf16 %v414_v36, %v413_v35  ;;  %v398_v43 = vld [vmem:[#allocation8 + $0x8] sm:$0xff]  ;;  %v415_v46 = vld [vmem:[#allocation8 + $0x90] sm:$0xff] }
  0x63   :  { %v841_v40 = vpack.c.bf16 %v446_v39, %v445_v37  ;;  %v397_v42 = vld [vmem:[#allocation8] sm:$0xff]  ;;  %v430_v45 = vld [vmem:[#allocation8 + $0x108] sm:$0xff]  ;;  %v416_v48 = vld [vmem:[#allocation8 + $0x98] sm:$0xff] }
  0x64   :  { %768 = vmatpush1.bf16.msra.mxu1 %v767_v13  ;;  %v429_v44 = vld [vmem:[#allocation8 + $0x100] sm:$0xff]  ;;  %v447_v49 = vld [vmem:[#allocation8 + $0x190] sm:$0xff]  ;;  %v448_v50 = vld [vmem:[#allocation8 + $0x198] sm:$0xff]  ;;  %v811_v53 = vpack.c.bf16 %v398_v43, %v397_v42  ;;  %v813_v58 = vpack.c.bf16 %v416_v48, %v415_v46 }
  0x65   :  { %800 = vmatpush1.bf16.msra.mxu0 %v799_v14  ;;  %770 = vmatprep.subr.bf16.mxu1 %v769_v15  ;;  %v843_v54 = vpack.c.bf16 %v430_v45, %v429_v44  ;;  %v399_v55 = vld [vmem:[#allocation8 + $0x10] sm:$0xff]  ;;  %v400_v56 = vld [vmem:[#allocation8 + $0x18] sm:$0xff]  ;;  %v845_v59 = vpack.c.bf16 %v448_v50, %v447_v49  ;;  %v417_v62 = vld [vmem:[#allocation8 + $0xa0] sm:$0xff] }
  0x66   :  { %802 = vmatprep.subr.bf16.mxu0 %v801_v18  ;;  %v431_v60 = vld [vmem:[#allocation8 + $0x110] sm:$0xff]  ;;  %v432_v61 = vld [vmem:[#allocation8 + $0x118] sm:$0xff]  ;;  %v418_v63 = vld [vmem:[#allocation8 + $0xa8] sm:$0xff]  ;;  %v815_v2 = vpack.c.bf16 %v400_v56, %v399_v55 }
  0x67   :  { %v449_v0 = vld [vmem:[#allocation8 + $0x1a0] sm:$0xff]  ;;  %v450_v1 = vld [vmem:[#allocation8 + $0x1a8] sm:$0xff]  ;;  %v847_v3 = vpack.c.bf16 %v432_v61, %v431_v60  ;;  %v817_v6 = vpack.c.bf16 %v418_v63, %v417_v62  ;;  %v419_v10 = vld [vmem:[#allocation8 + $0xb0] sm:$0xff] }
  0x68   :  { %772 = vmatpush1.bf16.msra.mxu1 %v771_v21  ;;  %v401_v4 = vld [vmem:[#allocation8 + $0x20] sm:$0xff]  ;;  %v402_v5 = vld [vmem:[#allocation8 + $0x28] sm:$0xff]  ;;  %v849_v7 = vpack.c.bf16 %v450_v1, %v449_v0  ;;  %v420_v11 = vld [vmem:[#allocation8 + $0xb8] sm:$0xff] }
  0x69   :  { %804 = vmatpush1.bf16.msra.mxu0 %v803_v22  ;;  %774 = vmatprep.subr.bf16.mxu1 %v773_v26  ;;  %v433_v8 = vld [vmem:[#allocation8 + $0x120] sm:$0xff]  ;;  %v434_v9 = vld [vmem:[#allocation8 + $0x128] sm:$0xff]  ;;  %v451_v12 = vld [vmem:[#allocation8 + $0x1b0] sm:$0xff]  ;;  %v819_v14 = vpack.c.bf16 %v402_v5, %v401_v4  ;;  %v821_v18 = vpack.c.bf16 %v420_v11, %v419_v10 }
  0x6a   :  { %806 = vmatprep.subr.bf16.mxu0 %v805_v30  ;;  %v452_v13 = vld [vmem:[#allocation8 + $0x1b8] sm:$0xff]  ;;  %v851_v15 = vpack.c.bf16 %v434_v9, %v433_v8  ;;  %v403_v16 = vld [vmem:[#allocation8 + $0x30] sm:$0xff]  ;;  %v421_v22 = vld [vmem:[#allocation8 + $0xc0] sm:$0xff]  ;;  %v231_v8 = vlaneseq }
  0x6b   :  { %v404_v17 = vld [vmem:[#allocation8 + $0x38] sm:$0xff]  ;;  %v853_v19 = vpack.c.bf16 %v452_v13, %v451_v12  ;;  %v435_v20 = vld [vmem:[#allocation8 + $0x130] sm:$0xff]  ;;  %v422_v23 = vld [vmem:[#allocation8 + $0xc8] sm:$0xff] }
  0x6c   :  { %776 = vmatpush1.bf16.msra.mxu1 %v775_v31  ;;  %v436_v21 = vld [vmem:[#allocation8 + $0x138] sm:$0xff]  ;;  %v453_v24 = vld [vmem:[#allocation8 + $0x1c0] sm:$0xff]  ;;  %v454_v25 = vld [vmem:[#allocation8 + $0x1c8] sm:$0xff]  ;;  %v823_v26 = vpack.c.bf16 %v404_v17, %v403_v16  ;;  %v825_v30 = vpack.c.bf16 %v422_v23, %v421_v22  ;;  %v232_v9 = vshrl.u32 %v231_v8, 7 }
  0x6d   :  { %808 = vmatpush1.bf16.msra.mxu0 %v807_v34  ;;  %810 = vmatprep.subr.bf16.mxu1 %v809_v38  ;;  %v855_v27 = vpack.c.bf16 %v436_v21, %v435_v20  ;;  %v405_v28 = vld [vmem:[#allocation8 + $0x40] sm:$0xff]  ;;  %v406_v29 = vld [vmem:[#allocation8 + $0x48] sm:$0xff]  ;;  %v857_v31 = vpack.c.bf16 %v454_v25, %v453_v24  ;;  %v423_v34 = vld [vmem:[#allocation8 + $0xd0] sm:$0xff] }
  0x6e   :  { %842 = vmatprep.subr.bf16.mxu0 %v841_v40  ;;  %v437_v32 = vld [vmem:[#allocation8 + $0x140] sm:$0xff]  ;;  %v438_v33 = vld [vmem:[#allocation8 + $0x148] sm:$0xff]  ;;  %v424_v35 = vld [vmem:[#allocation8 + $0xd8] sm:$0xff]  ;;  %v827_v38 = vpack.c.bf16 %v406_v29, %v405_v28  ;;  %v233_v10 = vsub.s32 0, %v232_v9  ;;  %v241_v11 = vsub.s32 2, %v232_v9  ;;  %v237_v13 = vsub.s32 1, %v232_v9 }
  0x6f   :  { %v455_v36 = vld [vmem:[#allocation8 + $0x1d0] sm:$0xff]  ;;  %v456_v37 = vld [vmem:[#allocation8 + $0x1d8] sm:$0xff]  ;;  %v859_v39 = vpack.c.bf16 %v438_v33, %v437_v32  ;;  %v829_v42 = vpack.c.bf16 %v424_v35, %v423_v34  ;;  %v425_v46 = vld [vmem:[#allocation8 + $0xe0] sm:$0xff] }
  0x70   :  { %v407_v40 = vld [vmem:[#allocation8 + $0x50] sm:$0xff]  ;;  %v861_v43 = vpack.c.bf16 %v456_v37, %v455_v36  ;;  %v440_v45 = vld [vmem:[#allocation8 + $0x158] sm:$0xff]  ;;  %v457_v48 = vld [vmem:[#allocation8 + $0x1e0] sm:$0xff] }
  0x71   :  { %v439_v44 = vld [vmem:[#allocation8 + $0x150] sm:$0xff]  ;;  %v458_v49 = vld [vmem:[#allocation8 + $0x1e8] sm:$0xff]  ;;  %v441_v56 = vld [vmem:[#allocation8 + $0x160] sm:$0xff] }
  0x72   :  { %v410_v55 = vld [vmem:[#allocation8 + $0x68] sm:$0xff]  ;;  %v427_v60 = vld [vmem:[#allocation8 + $0xf0] sm:$0xff]  ;;  %v428_v61 = vld [vmem:[#allocation8 + $0xf8] sm:$0xff] }
  0x73   :  { %v459_v62 = vld [vmem:[#allocation8 + $0x1f0] sm:$0xff]  ;;  %v837_v63 = vpack.c.bf16 %v428_v61, %v427_v60  ;;  %v460_v0 = vld [vmem:[#allocation8 + $0x1f8] sm:$0xff] }
  0x74   :  { %v411_v1 = vld [vmem:[#allocation8 + $0x70] sm:$0xff] }
  0x75   :  { %v443_v5 = vld [vmem:[#allocation8 + $0x170] sm:$0xff] }
  0x76   :  { %v229_v12 = vld [vmem:[%s1140_s4] sm:$0xf] }
  0x77   :  { %v242_v16 = vrot.slane %v229_v12, %v241_v11  ;;  %v238_v17 = vrot.slane %v229_v12, %v237_v13  ;;  %v667_v33 = vld [vmem:[%s1142_s6] ss:$0 sm:$0xff]  ;;  %s1018_s6 = smov [#allocation10]  }
 0x120   :  { %v160_v47 = vpop.f32.mrb[0].mxu0 }
 0x121   :  { %v161_v51 = vadd.f32 %v665_v41, %v160_v47  ;;  %v744_v52 = vpop.f32.mrb[1].mxu0  ;;  %v408_v41 = vld [vmem:[#allocation8 + $0x58] sm:$0xff]  ;;  %v426_v47 = vld [vmem:[#allocation8 + $0xe8] sm:$0xff] }
 0x122   :  { %v831_v50 = vpack.c.bf16 %v408_v41, %v407_v40  ;;  %v833_v52 = vpack.c.bf16 %v426_v47, %v425_v46 }
 0x123   :  { %v164_v57 = vmax.f32 %v161_v51, 0.0  ;;  %v863_v51 = vpack.c.bf16 %v440_v45, %v439_v44 }
 0x125   :  { %316 = vmatmul.mubr.f32.vlgmr.msra.gmra.mrb[0].mxu1 %v164_v57  ;;  %387 = vmatmul.mubr.f32.vlgmr.msra.gmra.mrb[2].mxu0 %v164_v57 }
 0x126   :  { %812 = vmatpush3.bf16.msra.mxu1 %v811_v53  ;;  %844 = vmatpush3.bf16.msra.mxu0 %v843_v54  ;;  %v865_v53 = vpack.c.bf16 %v458_v49, %v457_v48  ;;  %v409_v54 = vld [vmem:[#allocation8 + $0x60] sm:$0xff] }
 0x127   :  { %814 = vmatprep.subr.bf16.mxu1 %v813_v58  ;;  %846 = vmatprep.subr.bf16.mxu0 %v845_v59  ;;  %v835_v57 = vpack.c.bf16 %v410_v55, %v409_v54  ;;  %v442_v58 = vld [vmem:[#allocation8 + $0x168] sm:$0xff] }
 0x128   :  { %v867_v59 = vpack.c.bf16 %v442_v58, %v441_v56 }
 0x12a   :  { %816 = vmatpush3.bf16.msra.mxu1 %v815_v2  ;;  %848 = vmatpush3.bf16.msra.mxu0 %v847_v3  ;;  %v412_v2 = vld [vmem:[#allocation8 + $0x78] sm:$0xff]  ;;  %v869_v3 = vpack.c.bf16 %v460_v0, %v459_v62 }
 0x12b   :  { %818 = vmatprep.subr.bf16.mxu1 %v817_v6  ;;  %850 = vmatprep.subr.bf16.mxu0 %v849_v7  ;;  %v839_v4 = vpack.c.bf16 %v412_v2, %v411_v1  ;;  %v444_v6 = vld [vmem:[#allocation8 + $0x178] sm:$0xff] }
 0x12c   :  { %v871_v7 = vpack.c.bf16 %v444_v6, %v443_v5 }
 0x12e   :  { %820 = vmatpush3.bf16.msra.mxu1 %v819_v14  ;;  %852 = vmatpush3.bf16.msra.mxu0 %v851_v15  ;;  %v245_v14 = vsub.s32 3, %v232_v9  ;;  %v234_v15 = vrot.slane %v229_v12, %v233_v10 }
 0x12f   :  { %822 = vmatprep.subr.bf16.mxu1 %v821_v18  ;;  %854 = vmatprep.subr.bf16.mxu0 %v853_v19 }
 0x130   :  { %v246_v18 = vrot.slane %v229_v12, %v245_v14 }
 0x132   :  { %824 = vmatpush3.bf16.msra.mxu1 %v823_v26  ;;  %856 = vmatpush3.bf16.msra.mxu0 %v855_v27 }
 0x133   :  { %826 = vmatprep.subr.bf16.mxu1 %v825_v30  ;;  %858 = vmatprep.subr.bf16.mxu0 %v857_v31 }
 0x136   :  { %828 = vmatpush3.bf16.msra.mxu1 %v827_v38  ;;  %860 = vmatpush3.bf16.msra.mxu0 %v859_v39 }
 0x137   :  { %830 = vmatprep.subr.bf16.mxu1 %v829_v42  ;;  %862 = vmatprep.subr.bf16.mxu0 %v861_v43  ;;  %v608_v42 = vld [vmem:[%s1143_s7] sm:$0xf]  ;;  %s654_s7 = sshll.u32 %s1018_s6, 4  ;;  %s655_s7 = int_to_ptr.vmem [resolvable:$true] %s654_s7 }
 0x138   :  { %v627_v44 = vrot.slane %v608_v42, %v233_v10  ;;  %v633_v45 = vrot.slane %v608_v42, %v237_v13  ;;  %v639_v58 = vrot.slane %v608_v42, %v241_v11  ;;  %v644_v61 = vrot.slane %v608_v42, %v245_v14  ;;  %s978_s15 = scalar_lea.vmem %s655_s7, 128  ;;  %p983_p5 = scmp.lt.s32.totalorder %s655_s7, %s655_s7 }
 0x139   :  { %p979_p4 = scmp.ne.s32.totalorder %s655_s7, %s978_s15  ;;  %p984_p6 = scmp.lt.s32.totalorder %s978_s15, %s978_s15 }
 0x13a   :  { %832 = vmatpush3.bf16.msra.mxu1 %v831_v50  ;;  %864 = vmatpush3.bf16.msra.mxu0 %v863_v51 }
 0x13b   :  { %834 = vmatprep.subr.bf16.mxu1 %v833_v52  ;;  %866 = vmatprep.subr.bf16.mxu0 %v865_v53  ;;  %p985_p7 = por %p984_p6, %p983_p5 }
 0x13d   :  { %p986_p8 = pnand %p985_p7, %p979_p4 }
 0x13e   :  { %836 = vmatpush3.bf16.msra.mxu1 %v835_v57  ;;  %868 = vmatpush3.bf16.msra.mxu0 %v867_v59 }
 0x13f   :  { %838 = vmatprep.subr.bf16.mxu1 %v837_v63  ;;  %870 = vmatprep.subr.bf16.mxu0 %v869_v3 }
 0x142   :  { %840 = vmatpush3.bf16.msra.mxu1 %v839_v4  ;;  %872 = vmatpush3.bf16.msra.mxu0 %v871_v7 }
 0x1f8   :  { %v317_v19 = vpop.f32.mrb[0].mxu1  ;;  %v388_v20 = vpop.f32.mrb[2].mxu0 }
 0x1f9   :  { %v318_v21 = vadd.f32 %v317_v19, %v234_v15  ;;  %v389_v22 = vadd.f32 %v388_v20, %v242_v16  ;;  %v319_v23 = vpop.f32.mrb[1].mxu1  ;;  %v390_v24 = vpop.f32.mrb[3].mxu0 }
 0x1fa   :  { %v320_v25 = vadd.f32 %v319_v23, %v238_v17  ;;  %v391_v26 = vadd.f32 %v390_v24, %v246_v18 }
 0x1fb   :  { %v393_v29 = vmax.f32 %v318_v21, 0.0  ;;  %v395_v30 = vmax.f32 %v389_v22, 0.0 }
 0x1fc   :  { %v394_v27 = vmax.f32 %v320_v25, 0.0  ;;  %v396_v28 = vmax.f32 %v391_v26, 0.0 }
 0x1fe   :  { %532 = vmatprep.mubr.f32.mxu1 %v394_v27  ;;  %602 = vmatprep.mubr.f32.mxu0 %v396_v28 }
 0x1ff   :  { %533 = vmatmul.mubr.f32.vlgmr.msra.gmra.mrb[2].mxu1 %v393_v29  ;;  %603 = vmatmul.mubr.f32.vlgmr.msra.gmra.mrb[4].mxu0 %v395_v30 }
 0x2d2   :  { %v702_v31 = vpop.f32.mrb[2].mxu1  ;;  %v737_v32 = vpop.f32.mrb[4].mxu0 }
 0x2d3   :  { %v703_v34 = vpop.f32.mrb[3].mxu1  ;;  %v738_v35 = vpop.f32.mrb[5].mxu0 }
 0x2d4   :  { %v704_v36 = vadd.f32 %v703_v34, %v702_v31  ;;  %v739_v37 = vadd.f32 %v738_v35, %v737_v32 }
 0x2d6   :  { %v535_v38 = vadd.f32 %v704_v36, %v667_v33 }
 0x2d8   :  { %v605_v39 = vadd.f32 %v739_v37, %v535_v38 }
 0x2da   :  { %v610_v40 = vand.u32 2147483647, %v605_v39  ;;  %884 = vtanh.f32 %v605_v39  ;;  %v628_v47 = vmul.f32 %v627_v44, %v605_v39  ;;  %v609_v59 = vmax.f32 %v605_v39, 0.0 }
 0x2dc   :  { %v611_v41 = vsub.f32 0.0, %v610_v40 }
 0x2de   :  { %v612_v43 = vmul.f32 1.442695, %v611_v41 }
 0x2e0   :  { %886 = vpow2.f32 %v612_v43 }
 0x2e4   :  { %v885_v46 = vpop.eup %884 }
 0x2e5   :  { %v634_v48 = vmul.f32 %v885_v46, %v633_v45 }
 0x2e7   :  { %v635_v49 = vadd.f32 %v634_v48, %v628_v47 }
 0x2ea   :  { %v887_v50 = vpop.eup %886 }
 0x2eb   :  { %v614_v51 = vadd.f32 1.0, %v887_v50  ;;  %v617_v52 = vmul.f32 -0.5, %v887_v50  ;;  %v620_v54 = vand.u32 2147483647, %v887_v50 }
 0x2ed   :  { %888 = vlog2.f32 %v614_v51  ;;  %v618_v53 = vadd.f32 1.0, %v617_v52  ;;  %vm621_vm2 = vcmp.lt.f32.partialorder %v620_v54, 0.0004427343 }
 0x2ef   :  { %v619_v57 = vmul.f32 %v887_v50, %v618_v53 }
 0x2f7   :  { %v889_v55 = vpop.eup %888 }
 0x2f8   :  { %v616_v56 = vmul.f32 0.6931472, %v889_v55 }
 0x2fa   :  { %v622_v60 = vsel %vm621_vm2, %v619_v57, %v616_v56 }
 0x2fb   :  { %v623_v62 = vadd.f32 %v622_v60, %v609_v59 }
 0x2fd   :  { %v640_v63 = vmul.f32 %v639_v58, %v623_v62 }
 0x2ff   :  { %v645_v0 = vadd.f32 %v644_v61, %v640_v63 }
 0x301   :  { %v646_v1 = vadd.f32 %v645_v0, %v635_v49 }
 0x303   :  { %647 = vst [vmem:[#allocation10] sm:$0xff] %v646_v1 }
 0x304   :  { %989 = shalt.err (!%p986_p8)
}
 0x305   :  { %s990_s30 = scalar_lea.hbm %s1144_s8, 128 }
 0x306   :  { %p991_p9 = scmp.ne.s32.totalorder %s1144_s8, %s990_s30  ;;  %p994_p10 = scmp.lt.u32.totalorder %s990_s30, %s1144_s8 }
 0x308   :  { %p996_p11 = pnand %p994_p10, %p991_p9 }
 0x30a   :  { %999 = shalt.err (!%p996_p11)
}
 0x30b   :  { %657 = dma.vmem_to_hbm [thread:$0]  %s655_s7, 128, %s1144_s8, [#allocation4]  }
 0x30c   :  { %1006 = dma.done.wait [#allocation4], 128  }
 0x30d   :  { %1007 = vsyncadd [#allocation4], 4294967168 }
 0x30e   :  { %661 = vsyncpa [#allocation3], 1 }
 0x30f   :  { %662 = vsyncpa [#allocation6], 1 }
 0x310   :  { %663 = vsyncpa [#allocation9], 1 }
 0x311   :  { %664 = vsyncpa [#allocation4], 1 }

</bundles_post_ra>
